<compile_context>
chip_gen: v7x
topology: tpu7x:2x2x1
jax: 0.10.0
libtpu: 0.0.40
codegen_flags: <defaults>
</compile_context>

<pallas_src>
import functools
import math

import jax
import jax.numpy as jnp
import numpy as np
from jax.experimental import pallas as pl
from jax.experimental.pallas import tpu as pltpu


def _sinusoidal_kernel(time_ref, expand_ref, consts_ref, out_ref):
    # time_ref  : (tbf, k)      f32  folded timesteps; [r, g] = time[r*k + g]
    # expand_ref: (k, k*dim)    f32  0/1 matrix; expand[g, g*dim:(g+1)*dim] = 1
    # consts_ref: (2, k*dim)    f32  row 0 = freq (tiled k times), row 1 = phase
    # out_ref   : (tbf, k*dim)  f32  lane-dense output tile
    #
    # Lane-broadcast of time via the (idle) MXU.  HIGHEST precision keeps the
    # f32 timesteps exact (default precision would round them to bf16).
    t = jnp.dot(
        time_ref[...],
        expand_ref[...],
        precision=jax.lax.Precision.HIGHEST,
        preferred_element_type=jnp.float32,
    )
    c = consts_ref[...]
    freq = c[0:1, :]
    phase = c[1:2, :]
    # sin(x) == cos(x - pi/2): one transcendental per element, one mul + one
    # add on the VPU; every lane carries useful data.
    out_ref[...] = jnp.cos(t * freq + phase)


def _fold_factor(batch: int, dim: int) -> int:
    """Batch rows folded into the lane axis so the lane width is a 128-multiple."""
    if dim % 128 == 0:
        return 1
    k = 128 // math.gcd(dim, 128)
    if batch % k == 0:
        return k
    # TODO(synk): pad the batch (masked writeback) instead of falling back to a
    # lane-sparse layout when batch is not divisible by the fold factor.
    return 1


def _choose_block_rows(bf: int, lane_width: int) -> int:
    """Folded rows per block: ~4 MiB output blocks, >=2 grid steps once bf >= 16."""
    row_bytes = 4 * lane_width
    tbf = max(8, ((4 * 1024 * 1024) // row_bytes) // 8 * 8)
    if bf >= 16:
        half = -(-bf // 2)        # ceil(bf / 2)
        half = -(-half // 8) * 8  # round up to sublane multiple
        tbf = min(tbf, half)      # keep both v7x TensorCores busy
    return bf if tbf >= bf else tbf


@functools.partial(jax.jit, static_argnames=("dim",))
def sinusoidal_positional_embeddings(time: jax.Array, dim: int) -> jax.Array:
    """Pallas TPU implementation of SinusoidalPositionalEmbeddings.forward."""
    assert dim % 2 == 0 and dim >= 4, "dim must be even and >= 4"
    B = time.shape[0]
    half_dim = dim // 2

    # Trace-time constant tables (same f32 op sequence as the reference).
    scale = math.log(10000.0) / (half_dim - 1)
    freq_half = np.exp(
        np.arange(half_dim, dtype=np.float32) * np.float32(-scale)
    ).astype(np.float32)
    freq_row = np.repeat(freq_half, 2).astype(np.float32)          # freq_row[j] = freq_half[j//2]
    phase_row = np.where(
        (np.arange(dim) % 2) == 0, np.float32(-np.pi / 2.0), np.float32(0.0)
    ).astype(np.float32)

    k = _fold_factor(B, dim)
    kd = k * dim
    bf = B // k

    consts = np.stack([np.tile(freq_row, k), np.tile(phase_row, k)], axis=0)  # (2, kd)
    expand = np.kron(np.eye(k, dtype=np.float32), np.ones((1, dim), np.float32))  # (k, kd)

    time_f = time.astype(jnp.float32).reshape(bf, k)

    tbf = _choose_block_rows(bf, kd)
    grid = (pl.cdiv(bf, tbf),)

    out_f = pl.pallas_call(
        _sinusoidal_kernel,
        out_shape=jax.ShapeDtypeStruct((bf, kd), jnp.float32),
        grid=grid,
        in_specs=[
            pl.BlockSpec((tbf, k), lambda i: (i, 0)),   # folded timestep tile
            pl.BlockSpec((k, kd), lambda i: (0, 0)),    # 0/1 lane-broadcast matrix (resident)
            pl.BlockSpec((2, kd), lambda i: (0, 0)),    # freq + phase rows (resident)
        ],
        out_specs=pl.BlockSpec((tbf, kd), lambda i: (i, 0)),
        compiler_params=pltpu.CompilerParams(
            dimension_semantics=("parallel",),  # shard row-blocks across TCs (v7x megacore)
        ),
        cost_estimate=pl.CostEstimate(
            flops=4 * B * dim,
            transcendentals=B * dim,
            bytes_accessed=4 * (B * dim + B + 3 * kd),
        ),
    )(time_f, jnp.asarray(expand), jnp.asarray(consts))

    return out_f.reshape(B, dim)


def _reference_numpy(time: np.ndarray, dim: int) -> np.ndarray:
    half_dim = dim // 2
    emb = math.log(10000.0) / (half_dim - 1)
    emb = np.exp(np.arange(half_dim, dtype=np.float32) * np.float32(-emb))
    emb = time[:, None].astype(np.float32) * emb[None, :]
    out = np.empty((time.shape[0], dim), dtype=np.float32)
    out[:, 0::2] = np.sin(emb)
    out[:, 1::2] = np.cos(emb)
    return out


if __name__ == "__main__":
    key = jax.random.PRNGKey(0)
    dim = 32

    # Main check: small batch (single block, fully folded lane-dense layout).
    B = 8
    time = jax.random.uniform(key, (B,), dtype=jnp.float32, minval=0.0, maxval=1000.0)
    out = jax.block_until_ready(sinusoidal_positional_embeddings(time, dim))
    ref = _reference_numpy(np.asarray(time), dim)
    # atol covers the f32 rounding of the folded -pi/2 phase at arguments up to
    # ~1e3 (<= ~3e-5); mathematically identical to sin/cos.
    np.testing.assert_allclose(np.asarray(out), ref, rtol=1e-5, atol=1e-4)

    # Second check: multi-step grid with a ragged last block (no pad/slice path).
    B2 = 80
    time2 = jax.random.uniform(
        jax.random.PRNGKey(1), (B2,), dtype=jnp.float32, minval=0.0, maxval=1000.0
    )
    out2 = jax.block_until_ready(sinusoidal_positional_embeddings(time2, dim))
    ref2 = _reference_numpy(np.asarray(time2), dim)
    np.testing.assert_allclose(np.asarray(out2), ref2, rtol=1e-5, atol=1e-4)

    print("KERNEL_OK")
</pallas_src>

<mosaic_0001>
module attributes {stable_mosaic.version = 11 : i64} {
  func.func @_sinusoidal_kernel(%arg0: i32, %arg1: memref<2x4xf32, #tpu.memory_space<vmem>>, %arg2: memref<4x128xf32, #tpu.memory_space<vmem>>, %arg3: memref<2x128xf32, #tpu.memory_space<vmem>>, %arg4: memref<2x128xf32, #tpu.memory_space<vmem>>) attributes {dimension_semantics = [#tpu.dimension_semantics<parallel>], iteration_bounds = array<i64: 1>, scalar_prefetch = 0 : i64, scratch_operands = 0 : i64, tpu.core_type = #tpu.core_type<tc>, window_params = [{transform_indices = @transform_0, window_bounds = array<i64: 2, 4>}, {pipeline_mode = #tpu.pipeline_mode<synchronous>, transform_indices = @transform_1, window_bounds = array<i64: 4, 128>}, {pipeline_mode = #tpu.pipeline_mode<synchronous>, transform_indices = @transform_2, window_bounds = array<i64: 2, 128>}, {transform_indices = @transform_3, window_bounds = array<i64: 2, 128>}]} {
    %c0 = arith.constant 0 : index
    %c0_0 = arith.constant 0 : index
    %0 = vector.load %arg1[%c0, %c0_0] : memref<2x4xf32, #tpu.memory_space<vmem>>, vector<2x4xf32>
    %c0_1 = arith.constant 0 : index
    %c0_2 = arith.constant 0 : index
    %1 = vector.load %arg2[%c0_1, %c0_2] : memref<4x128xf32, #tpu.memory_space<vmem>>, vector<4x128xf32>
    %cst = arith.constant dense<0.000000e+00> : vector<2x128xf32>
    %2 = tpu.matmul %0, %1, %cst {dimension_numbers = #tpu.dot_dimension_numbers<[1], [0], [0], [1], [0, 0, 1, 1], [], []>, precision = #tpu.contract_precision<fp32>} : vector<2x4xf32>, vector<4x128xf32>, vector<2x128xf32> -> vector<2x128xf32>
    %c0_3 = arith.constant 0 : index
    %c0_4 = arith.constant 0 : index
    %3 = vector.load %arg3[%c0_3, %c0_4] : memref<2x128xf32, #tpu.memory_space<vmem>>, vector<2x128xf32>
    %4 = vector.extract_strided_slice %3 {offsets = [0, 0], sizes = [1, 128], strides = [1, 1]} : vector<2x128xf32> to vector<1x128xf32>
    %5 = vector.extract_strided_slice %3 {offsets = [1, 0], sizes = [1, 128], strides = [1, 1]} : vector<2x128xf32> to vector<1x128xf32>
    %6 = vector.broadcast %4 : vector<1x128xf32> to vector<2x128xf32>
    %7 = arith.mulf %2, %6 : vector<2x128xf32>
    %8 = vector.broadcast %5 : vector<1x128xf32> to vector<2x128xf32>
    %9 = arith.addf %7, %8 : vector<2x128xf32>
    %10 = math.cos %9 : vector<2x128xf32>
    %c0_5 = arith.constant 0 : index
    %c0_6 = arith.constant 0 : index
    %11 = vector.load %arg4[%c0_5, %c0_6] : memref<2x128xf32, #tpu.memory_space<vmem>>, vector<2x128xf32>
    tpu.vector_store %arg4[%c0_5, %c0_6], %10 {strides = array<i32>} : memref<2x128xf32, #tpu.memory_space<vmem>>, vector<2x128xf32>,
    return
  }
  func.func @transform_0(%arg0: i32) -> (i32, i32) {
    %c0_i32 = arith.constant 0 : i32
    %c0_i32_0 = arith.constant 0 : i32
    return %arg0, %c0_i32 : i32, i32
  }
  func.func @transform_1(%arg0: i32) -> (i32, i32) {
    %c0_i32 = arith.constant 0 : i32
    %c0_i32_0 = arith.constant 0 : i32
    %c0_i32_1 = arith.constant 0 : i32
    return %c0_i32, %c0_i32_0 : i32, i32
  }
  func.func @transform_2(%arg0: i32) -> (i32, i32) {
    %c0_i32 = arith.constant 0 : i32
    %c0_i32_0 = arith.constant 0 : i32
    %c0_i32_1 = arith.constant 0 : i32
    return %c0_i32, %c0_i32_0 : i32, i32
  }
  func.func @transform_3(%arg0: i32) -> (i32, i32) {
    %c0_i32 = arith.constant 0 : i32
    %c0_i32_0 = arith.constant 0 : i32
    return %arg0, %c0_i32 : i32, i32
  }
}

</mosaic_0001>

<bundles_post_ra>
// kernel: sinusoidal_positional_embeddings.1
= control target key start
LH: loop header
LB: loop body
LE: loop exit
PB: predicated region body
PF: predicated region fallthrough
CT: control target
= control target key end

     0   :  { %vm20_vm0 = vcmask 1043456   ;;  %vm16_vm1 = vcmask 31744   ;;  %v660_v0 = vmov 0.0   ;;  %vm661_vm2 = vmmov 0   ;;  %s727_s1 = inlined_call_operand.vmem [shape: f32[4,128], index: 1, kind: input, shape index: {}]   ;;  %s728_s0 = inlined_call_operand.vmem [shape: f32[2,4], index: 0, kind: input, shape index: {}]   ;;  %s729_s2 = inlined_call_operand.vmem [shape: f32[2,128], index: 2, kind: input, shape index: {}]   ;;  %s730_s3 = inlined_call_operand.vmem [shape: f32[2,128], index: 3, kind: output, shape index: {}]  }
   0x1   :  { %620 = vmatprep.subr.mxu0 %v660_v0  ;;  %v15_v1 = vld [vmem:[%s727_s1] sm:$0xf]  ;;  %622 = vmatprep.mubr.msk.f32.mxu0 %vm661_vm2, %v660_v0  ;;  %v471_v15 = vlaneseq  ;;  %v662_v39 = vmov 683565275   ;;  %v663_v41 = vmov 2475754826  }
   0x2   :  { %v14_v2 = vld [vmem:[%s728_s0] sm:$0x3]  ;;  %v22_v3 = vsel %vm20_vm0, %v15_v1, 0  ;;  %605 = vmatprep.subr.mxu1 %v660_v0  ;;  %607 = vmatprep.mubr.msk.f32.mxu1 %vm661_vm2, %v660_v0  ;;  %v664_v44 = vmov 2131351028  }
   0x3   :  { %v18_v4 = vsel %vm16_vm1, %v14_v2, 0  ;;  %v25_v5 = vand.u32 4294901760, %v22_v3  ;;  %v472_v16 = vshrl.u32 %v471_v15, 7  ;;  %v470_v19 = vld [vmem:[%s729_s2] sm:$0x3] }
   0x4   :  { %v90_v6 = vand.u32 4294901760, %v18_v4  ;;  %v665_v47 = vmov 2102212464   ;;  %v666_v50 = vmov 920167782  }
   0x5   :  { %v102_v7 = vsub.f32 %v22_v3, %v25_v5  ;;  %621 = vmatpush3.msra.mxu0 %v25_v5  ;;  %606 = vmatpush3.msra.mxu1 %v25_v5  ;;  %v473_v17 = vsub.s32 0, %v472_v16  ;;  %v478_v21 = vsub.s32 1, %v472_v16  ;;  %v667_v53 = vmov 1326507024  }
   0x6   :  { %v91_v8 = vsub.f32 %v18_v4, %v90_v6  ;;  %610 = vmatprep.subr.mxu1 %v660_v0  ;;  %625 = vmatprep.subr.mxu0 %v660_v0 }
   0x7   :  { %v103_v10 = vand.u32 4294901760, %v102_v7  ;;  %v474_v22 = vrot.slane %v470_v19, %v473_v17  ;;  %v479_v25 = vrot.slane %v470_v19, %v478_v21 }
   0x8   :  { %v92_v9 = vand.u32 4294901760, %v91_v8 }
   0x9   :  { %v104_v12 = vsub.f32 %v102_v7, %v103_v10 }
   0xa   :  { %623 = vmatmul.mubr.f32.vlgmr.msra.gmra.mrb[0].mxu0 %v92_v9  ;;  %v93_v11 = vsub.f32 %v91_v8, %v92_v9 }
   0xb   :  { %626 = vmatpush3.msra.mxu0 %v103_v10  ;;  %627 = vmatprep.mubr.msk.f32.mxu0 %vm661_vm2, %v660_v0  ;;  %v105_v14 = vand.u32 4294901760, %v104_v12 }
   0xc   :  { %v94_v13 = vand.u32 4294901760, %v93_v11  ;;  %630 = vmatprep.subr.mxu0 %v660_v0 }
   0xe   :  { %608 = vmatmul.mubr.f32.vlgmr.msra.gmra.mrb[0].mxu1 %v94_v13 }
   0xf   :  { %611 = vmatpush3.msra.mxu1 %v105_v14  ;;  %612 = vmatprep.mubr.msk.f32.mxu1 %vm661_vm2, %v660_v0 }
  0x10   :  { %615 = vmatprep.subr.mxu1 %v660_v0 }
  0x12   :  { %628 = vmatmul.mubr.f32.vlgmr.msra.gmra.mrb[0].mxu0 %v90_v6 }
  0x13   :  { %631 = vmatpush3.msra.mxu0 %v25_v5  ;;  %632 = vmatprep.mubr.msk.f32.mxu0 %vm661_vm2, %v660_v0 }
  0x16   :  { %613 = vmatmul.mubr.f32.vlgmr.msra.gmra.mrb[0].mxu1 %v90_v6 }
  0x17   :  { %616 = vmatpush3.msra.mxu1 %v102_v7  ;;  %617 = vmatprep.mubr.msk.f32.mxu1 %vm661_vm2, %v660_v0 }
  0x1a   :  { %633 = vmatmul.mubr.f32.vlgmr.msra.gmra.mrb[0].mxu0 %v90_v6 }
  0x1e   :  { %618 = vmatmul.mubr.f32.vlgmr.msra.gmra.mrb[0].mxu1 %v91_v8 }
  0xed   :  { %v466_v18 = vpop.f32.mrb[0].mxu0 }
  0xee   :  { %v634_v20 = vpop.f32.mrb[1].mxu0 }
  0xf1   :  { %v246_v23 = vpop.f32.mrb[0].mxu1 }
  0xf2   :  { %v635_v24 = vadd.f32 %v466_v18, %v246_v23  ;;  %v619_v26 = vpop.f32.mrb[1].mxu1 }
  0xf4   :  { %v475_v27 = vmul.f32 %v635_v24, %v474_v22 }
  0xf6   :  { %v703_v28 = vadd.f32 %v479_v25, %v475_v27 }
  0xf8   :  { %v484_v29 = vand.u32 2139095040, %v703_v28  ;;  %v481_v33 = vand.u32 2147483647, %v703_v28  ;;  %vm483_vm10 = vcmp.lt.s32.totalorder %v703_v28, 0  ;;  %vm573_vm15 = vweird.f32 %v703_v28 }
  0xfa   :  { %v485_v30 = vshrl.u32 %v484_v29, 23  ;;  %v488_v36 = vand.u32 8388607, %v481_v33  ;;  %vm482_vm11 = vcmp.le.f32.partialorder %v481_v33, 0.7853982 }
  0xfc   :  { %v589_v31 = vadd.s32 4294967169, %v485_v30  ;;  %v489_v55 = vor.u32 8388608, %v488_v36 }
  0xfe   :  { %v491_v32 = vadd.s32 1, %v589_v31  ;;  %v529_v5 = vshll.u32 %v489_v55, 8 }
 0x100   :  { %vm492_vm3 = vcmp.gt.s32.totalorder %v491_v32, 0 }
 0x101   :  { %v493_v34 = vsel %vm492_vm3, %v491_v32, 0 }
 0x102   :  { %v495_v35 = vand.u32 31, %v493_v34  ;;  %v494_v38 = vshrl.u32 %v493_v34, 5 }
 0x104   :  { %v496_v37 = vsub.s32 32, %v495_v35  ;;  %v498_v40 = vshll.u32 %v662_v39, %v495_v35  ;;  %v501_v42 = vshll.u32 %v663_v41, %v495_v35  ;;  %v504_v46 = vshll.u32 %v664_v44, %v495_v35 }
 0x105   :  { %v507_v49 = vshll.u32 %v665_v47, %v495_v35  ;;  %v510_v52 = vshll.u32 %v666_v50, %v495_v35  ;;  %vm513_vm4 = vcmp.lt.s32.totalorder %v494_v38, 1  ;;  %vm516_vm5 = vcmp.lt.s32.totalorder %v494_v38, 4 }
 0x106   :  { %v499_v43 = vshrl.u32 %v663_v41, %v496_v37  ;;  %v502_v45 = vshrl.u32 %v664_v44, %v496_v37  ;;  %v505_v48 = vshrl.u32 %v665_v47, %v496_v37  ;;  %v508_v51 = vshrl.u32 %v666_v50, %v496_v37 }
 0x107   :  { %v511_v54 = vshrl.u32 %v667_v53, %v496_v37  ;;  %v497_v0 = vshrl.u32 %v662_v39, %v496_v37  ;;  %vm515_vm6 = vcmp.lt.s32.totalorder %v494_v38, 3  ;;  %vm514_vm7 = vcmp.lt.s32.totalorder %v494_v38, 2 }
 0x108   :  { %v500_v56 = vor.u32 %v499_v43, %v498_v40  ;;  %v503_v57 = vor.u32 %v502_v45, %v501_v42  ;;  %v506_v58 = vor.u32 %v505_v48, %v504_v46  ;;  %v509_v59 = vor.u32 %v508_v51, %v507_v49 }
 0x109   :  { %v512_v60 = vor.u32 %v511_v54, %v510_v52 }
 0x10a   :  { %v518_v61 = vsel %vm516_vm5, %v506_v58, 2102212464  ;;  %v521_v62 = vsel %vm513_vm4, %v500_v56, %v503_v57  ;;  %v525_v63 = vsel %vm513_vm4, %v503_v57, %v506_v58  ;;  %v522_v1 = vsel %vm516_vm5, %v509_v59, 920167782 }
 0x10b   :  { %v526_v2 = vsel %vm516_vm5, %v512_v60, 1326507024  ;;  %v523_v3 = vsel %vm515_vm6, %v506_v58, %v522_v1  ;;  %v517_v6 = vsel %vm513_vm4, %v497_v0, %v500_v56  ;;  %v519_v7 = vsel %vm515_vm6, %v503_v57, %v518_v61 }
 0x10c   :  { %v527_v4 = vsel %vm515_vm6, %v509_v59, %v526_v2  ;;  %v524_v8 = vsel %vm514_vm7, %v521_v62, %v523_v3  ;;  %v520_v14 = vsel %vm514_vm7, %v517_v6, %v519_v7 }
 0x10d   :  { %v528_v9 = vsel %vm514_vm7, %v525_v63, %v527_v4  ;;  %v712_v12 = vmul.u32.u64.low %v529_v5, %v524_v8  ;;  %v713_v13 = vmul.u32.u64.high %v529_v5, %v524_v8, %v712_v12  ;;  %v536_v16 = vmul.u32 %v529_v5, %v520_v14 }
 0x10e   :  { %v709_v10 = vmul.u32.u64.low %v529_v5, %v528_v9  ;;  %v710_v11 = vmul.u32.u64.high %v529_v5, %v528_v9, %v709_v10 }
 0x10f   :  { %v539_v15 = vadd.s32 1, %v713_v13 }
 0x110   :  { %vm538_vm8 = vc.u32 %v710_v11, %v712_v12  ;;  %v537_v29 = vadd.s32 %v712_v12, %v710_v11 }
 0x111   :  { %v540_v17 = vsel %vm538_vm8, %v539_v15, %v713_v13 }
 0x112   :  { %v541_v18 = vadd.s32 %v540_v17, %v536_v16 }
 0x114   :  { %v542_v19 = vadd.s32 536870912, %v541_v18 }
 0x116   :  { %v543_v20 = vshrl.u32 %v542_v19, 30 }
 0x118   :  { %v544_v21 = vshll.u32 %v543_v20, 30  ;;  %v567_v44 = vsub.s32 4, %v543_v20 }
 0x11a   :  { %v545_v22 = vsub.s32 %v541_v18, %v544_v21  ;;  %v568_v46 = vsel %vm483_vm10, %v567_v44, %v543_v20 }
 0x11b   :  { %v570_v47 = vsel %vm482_vm11, 0, %v568_v46 }
 0x11c   :  { %v547_v23 = vsub.s32 0, %v545_v22  ;;  %v574_v48 = vand.u32 3, %v570_v47 }
 0x11e   :  { %v590_v24 = vmin.u32 %v547_v23, %v545_v22  ;;  %vm579_vm12 = vcmp.eq.s32.totalorder %v574_v48, 2  ;;  %vm576_vm13 = vcmp.eq.s32.totalorder %v574_v48, 0  ;;  %vm575_vm14 = vcmp.lt.s32.totalorder %v574_v48, 2 }
 0x120   :  { %v549_v25 = vclz %v590_v24 }
 0x122   :  { %v591_v26 = vadd.s32 4294967294, %v549_v25 }
 0x124   :  { %vm592_vm9 = vcmp.lt.s32.totalorder %v591_v26, 0 }
 0x125   :  { %v552_v27 = vsel %vm592_vm9, 0, %v591_v26 }
 0x126   :  { %v553_v30 = vsub.s32 32, %v552_v27  ;;  %v557_v31 = vsub.s32 4294967266, %v552_v27  ;;  %v554_v32 = vshll.u32 %v545_v22, %v552_v27 }
 0x128   :  { %v555_v34 = vshrl.u32 %v537_v29, %v553_v30  ;;  %v558_v35 = vadd.s32 127, %v557_v31 }
 0x12a   :  { %v556_v36 = vor.u32 %v555_v34, %v554_v32  ;;  %v559_v37 = vshll.u32 %v558_v35, 23 }
 0x12c   :  { %v560_v38 = vor.u32 4788187, %v559_v37  ;;  %v563_v40 = vcvt.s32.f32 %v556_v36 }
 0x12e   :  { %v561_v39 = vand.u32 2147483647, %v560_v38 }
 0x130   :  { %v564_v41 = vmul.f32 %v563_v40, %v561_v39 }
 0x132   :  { %v565_v42 = vxor.u32 2147483648, %v564_v41 }
 0x134   :  { %v566_v43 = vsel %vm483_vm10, %v565_v42, %v564_v41 }
 0x135   :  { %v569_v45 = vsel %vm482_vm11, %v703_v28, %v566_v43 }
 0x136   :  { %656 = vcosq.f32 %v569_v45 }
 0x137   :  { %658 = vsinq.f32 %v569_v45 }
 0x140   :  { %v657_v49 = vpop.eup %656 }
 0x141   :  { %v659_v50 = vpop.eup %658  ;;  %v580_v51 = vxor.u32 2147483648, %v657_v49 }
 0x142   :  { %v577_v52 = vxor.u32 2147483648, %v659_v50 }
 0x143   :  { %v581_v53 = vsel %vm579_vm12, %v580_v51, %v659_v50 }
 0x144   :  { %v578_v54 = vsel %vm576_vm13, %v657_v49, %v577_v52 }
 0x145   :  { %v582_v33 = vsel %vm575_vm14, %v578_v54, %v581_v53 }
 0x146   :  { %v583_v55 = vsel %vm573_vm15, nan, %v582_v33 }
 0x147   :  { %584 = vst [vmem:[%s730_s3] sm:$0x3] %v583_v55 }

</bundles_post_ra>
